<compile_context>
chip_gen: v7x
topology: tpu7x:2x2x1
jax: 0.10.0
libtpu: 0.0.40
codegen_flags: <defaults>
</compile_context>

<pallas_src>
import math

import jax
import jax.numpy as jnp
from jax.experimental import pallas as pl
from jax.experimental.pallas import tpu as pltpu


def _attn_dropout_kernel(mask_ref, x_ref, o_ref):
    # mask_ref: SMEM int32 [B] (scalar prefetch); x_ref/o_ref: VMEM blocks.
    drop = mask_ref[pl.program_id(0)] != 0

    @pl.when(drop)
    def _():
        # Whole batch row is dropped -> fill this tile with -inf.
        # (Input block is never read on this path; its DMA is elided by the
        #  mask-pinned input index_map.)
        o_ref[...] = jnp.full(o_ref.shape, -jnp.inf, dtype=o_ref.dtype)

    @pl.when(jnp.logical_not(drop))
    def _():
        # Identity path: straight copy (vld -> vst stream).
        o_ref[...] = x_ref[...]


def _vmem_budget():
    """Generation-aware (block_cap_bytes, vmem_limit_bytes)."""
    try:
        vmem_phys = int(pltpu.get_tpu_info().vmem_capacity_bytes)
    except Exception:
        vmem_phys = 64 << 20  # conservative: v7x per-TC VMEM
    # 8 MiB blocks on 128-MiB chips (v5e/v6e), 6 MiB on 64-MiB chips (v7x).
    block_cap = (8 << 20) if vmem_phys >= (128 << 20) else (6 << 20)
    # in + out, double-buffered -> 4x block, plus headroom; never exceed physical.
    vmem_limit = min(vmem_phys - (16 << 20), 4 * block_cap + (8 << 20))
    return block_cap, int(vmem_limit)


def _pick_lane(n):
    """Largest multiple-of-128 lane width dividing n (None if n % 128 != 0)."""
    for c in (1024, 512, 256, 128):
        if n % c == 0:
            return c
    return None


def _pick_tile_rows(rows, lane, itemsize, cap_bytes):
    """Row-tile: multiple of 8 capped at ~cap_bytes per block; full rows if small."""
    tr = max(8, (cap_bytes // (lane * itemsize)) // 8 * 8)
    if tr >= rows:
        return rows  # single block spanning the full row axis (always legal)
    return tr        # multiple of 8; ragged last block handled by Pallas (cdiv grid)


def _run_dense(x3, mask, block_cap, vmem_limit):
    """x3: float[B, rows, lane] with lane a multiple of 128."""
    B, rows, lane = x3.shape
    itemsize = jnp.dtype(x3.dtype).itemsize
    tr = _pick_tile_rows(rows, lane, itemsize, block_cap)
    grid = (B, pl.cdiv(rows, tr))

    # Input map pins the tile index to 0 for dropped batches -> the repeated
    # block index lets Pallas elide the (never-read) HBM->VMEM input copy.
    in_map = lambda b, t, m: (b, jnp.where(m[b] != 0, 0, t), 0)
    out_map = lambda b, t, m: (b, t, 0)

    return pl.pallas_call(
        _attn_dropout_kernel,
        out_shape=jax.ShapeDtypeStruct(x3.shape, x3.dtype),
        grid_spec=pltpu.PrefetchScalarGridSpec(
            num_scalar_prefetch=1,
            grid=grid,
            in_specs=[pl.BlockSpec((1, tr, lane), in_map)],
            out_specs=pl.BlockSpec((1, tr, lane), out_map),
        ),
        compiler_params=pltpu.CompilerParams(
            dimension_semantics=("parallel", "arbitrary"),
            vmem_limit_bytes=vmem_limit,
        ),
    )(mask, x3)


def attn_dropout(x, mask, *, training=True):
    """x: float[B, ...]; mask: int-ish[B] (Bernoulli sample, nonzero => drop row)."""
    if not training:
        return x  # nn.Identity path in eval mode

    if not jnp.issubdtype(x.dtype, jnp.floating):
        raise TypeError("attn_dropout: -inf row fill requires a floating dtype.")

    B = x.shape[0]
    n = math.prod(x.shape[1:])
    mask = mask.reshape(B).astype(jnp.int32)
    block_cap, vmem_limit = _vmem_budget()

    lane = _pick_lane(n)
    if lane is not None:
        rows = n // lane
        out = _run_dense(x.reshape(B, rows, lane), mask, block_cap, vmem_limit)
        return out.reshape(x.shape)

    # Odd feature count: pad flat features to a multiple of 128, reuse the dense
    # tiled path (bounded VMEM, pipelined), then slice the padding back off.
    lane = 128
    n_pad = ((n + lane - 1) // lane) * lane
    x_flat = jnp.pad(x.reshape(B, n), ((0, 0), (0, n_pad - n)))
    out = _run_dense(x_flat.reshape(B, n_pad // lane, lane), mask, block_cap, vmem_limit)
    return out.reshape(B, n_pad)[:, :n].reshape(x.shape)


if __name__ == "__main__":
    key = jax.random.PRNGKey(0)
    kx, kmask = jax.random.split(key)

    B, H, S = 2, 4, 16
    p_dropout = 0.1

    x = jax.random.normal(kx, (B, H, S, S), dtype=jnp.float32)
    # Bernoulli(p_dropout) sample of shape [B] -- mirrors
    # torch.distributions.Bernoulli(p).sample([B]).squeeze()
    mask = jax.random.bernoulli(kmask, p_dropout, (B,)).astype(jnp.int32)

    def ref(x, m):
        return jnp.where((m != 0).reshape((-1,) + (1,) * (x.ndim - 1)), -jnp.inf, x)

    # Training path (kernel), sampled mask
    y_train = jax.block_until_ready(attn_dropout(x, mask, training=True))
    assert jnp.array_equal(y_train, ref(x, mask)), "mismatch (sampled mask)"

    # Training path, explicit mask exercising the drop branch + elided input DMA
    mask_drop = jnp.array([1, 0], dtype=jnp.int32)
    y_drop = jax.block_until_ready(attn_dropout(x, mask_drop, training=True))
    assert jnp.array_equal(y_drop, ref(x, mask_drop)), "mismatch (explicit mask)"

    # Odd feature count -> exercises the pad-to-128 fallback path
    x_odd = jax.random.normal(kx, (2, 3, 5, 7), dtype=jnp.float32)
    mask_odd = jnp.array([0, 1], dtype=jnp.int32)
    y_odd = jax.block_until_ready(attn_dropout(x_odd, mask_odd, training=True))
    assert jnp.array_equal(y_odd, ref(x_odd, mask_odd)), "mismatch (odd-shape path)"

    # Eval path (identity)
    y_eval = jax.block_until_ready(attn_dropout(x, mask, training=False))
    assert jnp.array_equal(y_eval, x), "mismatch (eval path)"

    print("KERNEL_OK")
</pallas_src>

<mosaic_0001>
module attributes {stable_mosaic.version = 11 : i64} {
  func.func @_attn_dropout_kernel(%arg0: i32, %arg1: i32, %arg2: memref<2xi32, #tpu.memory_space<smem>>, %arg3: memref<1x1x1024xf32, #tpu.memory_space<vmem>>, %arg4: memref<1x1x1024xf32, #tpu.memory_space<vmem>>) attributes {dimension_semantics = [#tpu.dimension_semantics<parallel>, #tpu.dimension_semantics<arbitrary>], iteration_bounds = array<i64: 2, 1>, scalar_prefetch = 1 : i64, scratch_operands = 0 : i64, tpu.core_type = #tpu.core_type<tc>, window_params = [{transform_indices = @transform_0, window_bounds = array<i64: 1, 1, 1024>}, {transform_indices = @transform_1, window_bounds = array<i64: 1, 1, 1024>}]} {
    %0 = arith.index_cast %arg0 : i32 to index
    %1 = memref.load %arg2[%0] : memref<2xi32, #tpu.memory_space<smem>>
    %c0_i32 = arith.constant 0 : i32
    %2 = arith.cmpi ne, %1, %c0_i32 : i32
    %3 = arith.extui %2 : i1 to i32
    %c0_i32_0 = arith.constant 0 : i32
    %4 = arith.cmpi ne, %3, %c0_i32_0 : i32
    scf.if %4 {
      %cst = arith.constant 0xFF800000 : f32
      %8 = vector.broadcast %cst : f32 to vector<1x1x1024xf32>
      %c0 = arith.constant 0 : index
      %c0_2 = arith.constant 0 : index
      %c0_3 = arith.constant 0 : index
      %9 = vector.load %arg4[%c0, %c0_2, %c0_3] : memref<1x1x1024xf32, #tpu.memory_space<vmem>>, vector<1x1x1024xf32>
      tpu.vector_store %arg4[%c0, %c0_2, %c0_3], %8 {strides = array<i32>} : memref<1x1x1024xf32, #tpu.memory_space<vmem>>, vector<1x1x1024xf32>,
    } else {
    }
    %true = arith.constant true
    %5 = arith.xori %2, %true : i1
    %6 = arith.extui %5 : i1 to i32
    %c0_i32_1 = arith.constant 0 : i32
    %7 = arith.cmpi ne, %6, %c0_i32_1 : i32
    scf.if %7 {
      %c0 = arith.constant 0 : index
      %c0_2 = arith.constant 0 : index
      %c0_3 = arith.constant 0 : index
      %8 = vector.load %arg3[%c0, %c0_2, %c0_3] : memref<1x1x1024xf32, #tpu.memory_space<vmem>>, vector<1x1x1024xf32>
      %c0_4 = arith.constant 0 : index
      %c0_5 = arith.constant 0 : index
      %c0_6 = arith.constant 0 : index
      %9 = vector.load %arg4[%c0_4, %c0_5, %c0_6] : memref<1x1x1024xf32, #tpu.memory_space<vmem>>, vector<1x1x1024xf32>
      tpu.vector_store %arg4[%c0_4, %c0_5, %c0_6], %8 {strides = array<i32>} : memref<1x1x1024xf32, #tpu.memory_space<vmem>>, vector<1x1x1024xf32>,
    } else {
    }
    return
  }
  func.func @transform_0(%arg0: i32, %arg1: i32, %arg2: memref<2xi32, #tpu.memory_space<smem>>) -> (i32, i32, i32) {
    %0 = arith.index_cast %arg0 : i32 to index
    %1 = memref.load %arg2[%0] : memref<2xi32, #tpu.memory_space<smem>>
    %c0_i32 = arith.constant 0 : i32
    %2 = arith.cmpi ne, %1, %c0_i32 : i32
    %c0_i32_0 = arith.constant 0 : i32
    %3 = arith.select %2, %c0_i32_0, %arg1 : i32
    %c0_i32_1 = arith.constant 0 : i32
    %c0_i32_2 = arith.constant 0 : i32
    return %arg0, %3, %c0_i32_1 : i32, i32, i32
  }
  func.func @transform_1(%arg0: i32, %arg1: i32, %arg2: memref<2xi32, #tpu.memory_space<smem>>) -> (i32, i32, i32) {
    %c0_i32 = arith.constant 0 : i32
    %c0_i32_0 = arith.constant 0 : i32
    return %arg0, %arg1, %c0_i32 : i32, i32, i32
  }
}

</mosaic_0001>

<bundles_post_ra>
// kernel: tpu_custom_call.1
= control target key start
LH: loop header
LB: loop body
LE: loop exit
PB: predicated region body
PF: predicated region fallthrough
CT: control target
= control target key end

     0   :  { %s688_s0 = inlined_call_operand.hbm [shape: s32[2], index: 0, kind: input, shape index: {}]   ;;  %s689_s1 = inlined_call_operand.hbm [shape: f32[2,1,1024], index: 1, kind: input, shape index: {}]   ;;  %s690_s2 = inlined_call_operand.hbm [shape: f32[2,1,1024], index: 2, kind: output, shape index: {}]  }
   0x1   :  { %s364_s11 = scalar_lea.hbm %s688_s0, 16 }
   0x2   :  { %p365_p0 = scmp.ne.s32.totalorder %s688_s0, %s364_s11  ;;  %p368_p1 = scmp.lt.u32.totalorder %s364_s11, %s688_s0 }
   0x4   :  { %p370_p2 = pnand %p368_p1, %p365_p0 }
   0x6   :  { %373 = shalt.err (!%p370_p2)  }
   0x7   :  { %s490_s16 = smov [#allocation3]  }
   0x8   :  { %8 = dma.hbm_to_smem %s688_s0, 16, %s490_s16, [#allocation2] }
   0x9   :  { %456 = dma.done.wait [#allocation2], 16 }
   0xa   :  { %457 = vsyncadd [#allocation2], 4294967280 }
   0xb   :  { %10 = sfence }
   0xc   :  { %11 = vsyncpa [#allocation5], 0 }
   0xd   :  { %13 = vsyncpa [#allocation5 + $0x1], 0 }
   0xe   :  { %14 = vsyncpa [#allocation6], 0 }
   0xf   :  { %16 = vsyncpa [#allocation6 + $0x1], 0  ;;  %s521_s19 = smov 0   ;;  %s523_s20 = smov 0  }
  0x10   :  { %s525_s21 = smov 0   ;;  %s527_s22 = smov 0  }
  0x11   :  { %s529_s23 = smov 0   ;;  %s531_s24 = smov 0  }
  0x12 LB: > { %s281_s0 = sadd.s32 4294967295, %s488_s24   ;;  %s282_s25 = sadd.s32 4294967294, %s488_s24   ;;  %s488_s24 = sphi %s531_s24, %s22_s24   ;;  %s484_s23 = sphi %s529_s23, %s706_s23   ;;  %s480_s22 = sphi %s527_s22, %s705_s22   ;;  %s476_s21 = sphi %s525_s21, %s704_s21   ;;  %s472_s20 = sphi %s523_s20, %s703_s20   ;;  %s468_s19 = sphi %s521_s19, %s702_s19  }
  0x13   : > { %s34_s26 = sadd.s32 1, %s484_s23  ;;  %s49_s27 = sadd.s32 1, %s476_s21 }
  0x14   : > { %p36_p3 = scmp.ge.s32.totalorder %s34_s26, 2  ;;  %p56_p4 = scmp.ne.s32.totalorder %s476_s21, %s472_s20 }
  0x15   : > { %p57_p5 = scmp.eq.s32.totalorder %s488_s24, 0  ;;  %p62_p6 = scmp.ne.s32.totalorder %s472_s20, %s468_s19 }
  0x16   : > { %s708_s26 = smov (%p36_p3, %s34_s26), 0  ;;  %p63_p8 = scmp.eq.s32.totalorder %s281_s0, 0 }
  0x17   : > { %p562_p7 = por %p57_p5, %p56_p4  ;;  %s44_s29 = ssub.s32 %s484_s23, %s708_s26 }
  0x18   : > { %p88_p9 = scmp.eq.s32.totalorder %s281_s0, 1  ;;  %p47_p10 = scmp.eq.s32.totalorder %s44_s29, 0 }
  0x19   : > { %p568_p11 = por %p63_p8, %p62_p6  ;;  %p94_p13 = scmp.eq.s32.totalorder %s282_s25, 1 }
  0x1a   : > { %p572_p12 = por %p88_p9, %p56_p4  ;;  %p312_p2 = scmp.lt.s32.totalorder %s488_s24, 2 }
  0x1b   : > { %s577_s4 = scalar_select %p47_p10, %s476_s21, %s49_s27  }
  0x1c   : > { %s694_s3 = scalar_select %p572_p12, 1, 0 }
  0x1d   : > { %p579_p0 = por %p94_p13, %p62_p6  ;;  %s114_s6 = sand.u32 1, %s476_s21  }
  0x1e   : > { %s285_s7 = sshll.u32 %s114_s6, 3  ;;  %s298_s8 = sshll.u32 %s484_s23, 7 }
  0x1f   : > { %s695_s5 = scalar_select %p579_p0, 1, 0 }
  0x20   : > { %s590_s11 = scalar_lea.hbm %s689_s1, %s298_s8  ;;  %s118_s12 = scalar_lea.vmem [#allocation4], %s285_s7 }
  0x21   : > { %s131_s13 = sshll.u32 %s118_s12, 4  ;;  %p596_p3 = pnand %p312_p2, %p562_p7  ;;  %s592_s13 = int_to_ptr.vmem [resolvable:$true] %s131_s13 }
  0x22   : > { %s115_s15 = scalar_lea.sflag [#allocation5], %s114_s6  ;;  %s374_s16 = scalar_lea.hbm %s590_s11, 128 }
  0x23   : > { %p375_p6 = scmp.ne.s32.totalorder %s590_s11, %s374_s16  ;;  %p376_p8 = pneg %p596_p3 }
  0x24   : > { %s379_s0 = scalar_lea.hbm %s689_s1, 256  ;;  %p380_p7 = scmp.lt.u32.totalorder %s590_s11, %s689_s1 }
  0x25   : > { %p377_p9 = pnand %p376_p8, %p375_p6  ;;  %p381_p13 = scmp.lt.u32.totalorder %s379_s0, %s374_s16 }
  0x26   : > { %p383_p1 = scmp.lt.u32.totalorder %s374_s16, %s590_s11 }
  0x27   : > { %p378_p10 = pneg %p377_p9  ;;  %p382_p2 = por %p381_p13, %p380_p7 }
  0x29   : > { %p384_p4 = por %p383_p1, %p382_p2 }
  0x2b   : > { %p385_p5 = pnand %p384_p4, %p378_p10 }
  0x2d   : > { %388 = shalt.err (!%p385_p5)
}
  0x2e   : > { %s389_s28 = scalar_lea.vmem %s592_s13, 128  ;;  %s491_s29 = smov [#allocation4]  }
  0x2f   : > { %p390_p6 = scmp.ne.s32.totalorder %s592_s13, %s389_s28  ;;  %s394_s6 = sshll.u32 %s491_s29, 4  ;;  %s395_s6 = int_to_ptr.vmem [resolvable:$false] %s394_s6 }
  0x30   : > { %s396_s7 = scalar_lea.vmem %s395_s6, 256  ;;  %p397_p12 = scmp.lt.s32.totalorder %s592_s13, %s395_s6 }
  0x31   : > { %p392_p9 = pnand %p390_p6, %p376_p8  ;;  %p398_p7 = scmp.lt.s32.totalorder %s396_s7, %s389_s28 }
  0x33   : > { %p393_p0 = pneg %p392_p9  ;;  %p399_p13 = por %p398_p7, %p397_p12 }
  0x35   : > { %p400_p1 = pnand %p399_p13, %p393_p0 }
  0x37   : > { %403 = shalt.err (!%p400_p1)
}
  0x38   : > { %307 = dma.hbm_to_vmem [thread:$0]  (!%p596_p3), %s590_s11, 128, %s592_s13, %s115_s15  }
  0x39   : > { %p697_p4 = scmp.lt.s32.totalorder %s488_s24, 3  ;;  %p698_p5 = scmp.ge.s32.totalorder %s488_s24, 1 }
  0x3b   : > { %p137_p8 = pnand %p698_p5, %p697_p4 }
  0x3c   : > { %s632_s8 = sand.u32 (!%p137_p8), 1, %s472_s20  }
  0x3d   : > { %140 = sbr.rel (%p137_p8) target bundleno = 118 (0x76), region = 24  ;;  %s289_s9 = sshll.u32 (!%p137_p8), %s632_s8, 3 }
  0x3e   : > { %s143_s10 = scalar_lea.sflag (!%p137_p8), [#allocation5], %s632_s8  ;;  %s146_s12 = scalar_lea.vmem (!%p137_p8), [#allocation4], %s289_s9 }
  0x44   : > { %459 = dma.done.wait (%p568_p11), %s143_s10, 128  }
  0x45   : > { %461 = vsyncadd (%p568_p11), %s143_s10, 4294967168  ;;  %s168_s11 = sld [smem:[#allocation3 + %s480_s22]]  ;;  %s164_s13 = scalar_lea.vmem [#allocation7], %s289_s9 }
  0x4b   : > { %p291_p12 = scmp.eq.s32.totalorder %s168_s11, 0 }
  0x4c   : > { %v492_v0 = vmov (!%p291_p12), -inf  }
  0x4d   : > { %172 = sbr.rel (%p291_p12) target bundleno = 84 (0x54), region = 32  ;;  %173 = vst [vmem:[%s164_s13] sm:$0xff] (!%p291_p12), %v492_v0 }
  0x54 PF: > { %p292_p0 = scmp.ne.s32.totalorder %s168_s11, 0 }
  0x55   : > { %v178_v1 = vld [vmem:[%s146_s12] sm:$0xff] (!%p292_p0) }
  0x56   : > { %177 = sbr.rel (%p292_p0) target bundleno = 93 (0x5d), region = 36  ;;  %179 = vst [vmem:[%s164_s13] sm:$0xff] (!%p292_p0), %v178_v1 }
  0x5d PF: > { %s299_s14 = sshll.u32 %s480_s22, 7  ;;  %s197_s17 = sshll.u32 %s164_s13, 4  ;;  %s198_s17 = int_to_ptr.vmem [resolvable:$true] %s197_s17 }
  0x5e   : > { %s645_s16 = scalar_lea.hbm %s690_s2, %s299_s14  ;;  %s181_s18 = scalar_lea.sflag [#allocation6], %s632_s8 }
  0x5f   : > { %s404_s0 = scalar_lea.vmem %s198_s17, 128  ;;  %p699_p3 = scmp.ne.s32.totalorder %s694_s3, 0 }
  0x60   : > { %p405_p11 = scmp.ne.s32.totalorder %s198_s17, %s404_s0  ;;  %s493_s25 = smov [#allocation7]  }
  0x61   : > { %s408_s27 = sshll.u32 %s493_s25, 4  ;;  %s409_s27 = int_to_ptr.vmem [resolvable:$false] %s408_s27 }
  0x62   : > { %p406_p10 = pnand %p405_p11, %p699_p3  ;;  %s410_s28 = scalar_lea.vmem %s409_s27, 256 }
  0x63   : > { %p411_p6 = scmp.lt.s32.totalorder %s198_s17, %s409_s27  ;;  %p412_p9 = scmp.lt.s32.totalorder %s410_s28, %s404_s0 }
  0x64   : > { %p407_p2 = pneg %p406_p10 }
  0x65   : > { %p413_p7 = por %p412_p9, %p411_p6 }
  0x67   : > { %p414_p13 = pnand %p413_p7, %p407_p2 }
  0x69   : > { %417 = shalt.err (!%p414_p13)
}
  0x6a   : > { %s418_s22 = scalar_lea.hbm %s645_s16, 128  ;;  %s422_s7 = scalar_lea.hbm %s690_s2, 256 }
  0x6b   : > { %p419_p1 = scmp.ne.s32.totalorder %s645_s16, %s418_s22  ;;  %p423_p8 = scmp.lt.u32.totalorder %s645_s16, %s690_s2 }
  0x6c   : > { %p424_p12 = scmp.lt.u32.totalorder %s422_s7, %s418_s22  ;;  %p426_p11 = scmp.lt.u32.totalorder %s418_s22, %s645_s16 }
  0x6d   : > { %p420_p4 = pnand %p419_p1, %p699_p3 }
  0x6e   : > { %p425_p0 = por %p424_p12, %p423_p8 }
  0x6f   : > { %p421_p5 = pneg %p420_p4 }
  0x70   : > { %p427_p10 = por %p426_p11, %p425_p0 }
  0x72   : > { %p428_p2 = pnand %p427_p10, %p421_p5 }
  0x74   : > { %431 = shalt.err (!%p428_p2)
}
  0x75   : > { %302 = dma.vmem_to_hbm [thread:$0]  (%p699_p3), %s198_s17, 128, %s645_s16, %s181_s18  }
  0x76 PF: > { %s209_s10 = sand.u32 1, %s468_s19   ;;  %p700_p6 = scmp.ne.s32.totalorder %s695_s5, 0 }
  0x77   : > { %p701_p9 = scmp.ge.s32.totalorder %s488_s24, 2  ;;  %s210_s12 = scalar_lea.sflag [#allocation6], %s209_s10 }
  0x79   : > { %p309_p7 = pnand %p701_p9, %p700_p6 }
  0x7b   : > { %463 = dma.done.wait (!%p309_p7), %s210_s12, 128  }
  0x7c   : > { %465 = vsyncadd (!%p309_p7), %s210_s12, 4294967168  ;;  %s22_s24 = sadd.s32 1, %s488_s24   ;;  %s702_s19 = smov %s472_s20 }
  0x7d   : > { %p19_p13 = scmp.ge.s32.totalorder %s22_s24, 4   ;;  %s703_s20 = smov %s476_s21 }
  0x7e   : > { %s704_s21 = smov %s577_s4  ;;  %s705_s22 = smov %s484_s23 }
  0x7f   : > { %s706_s23 = smov %s708_s26  ;;  %21 = sbr.rel (!%p19_p13) target bundleno = 18 (0x12), region = 77 }
  0x86   :  { %215 = vsyncpa [#allocation5], 1 }
  0x87   :  { %217 = vsyncpa [#allocation5 + $0x1], 1 }
  0x88   :  { %218 = vsyncpa [#allocation6], 1 }
  0x89   :  { %220 = vsyncpa [#allocation6 + $0x1], 1 }

</bundles_post_ra>
